<compile_context>
chip_gen: v6e
topology: v6e:2x2x1
jax: 0.10.0
libtpu: 0.0.40
codegen_flags: <defaults>
</compile_context>

<pallas_src>
import jax
import jax.numpy as jnp
from jax.experimental import pallas as pl
from jax.experimental.pallas import tpu as pltpu

_LANE = 128
_MiB = 1024 * 1024


def _transpose_tile_kernel(x_ref, o_ref):
    # x_ref: (t_c, t_hw) lane-dense input tile; o_ref: (t_hw, t_c).
    # Pure data movement: one XLU (vxpose) transpose per tile. At these tile
    # sizes the XLU finishes far ahead of the HBM DMA, so the kernel remains
    # memory-bound on all generations; no MXU identity-matmul tricks.
    o_ref[...] = jnp.transpose(x_ref[...], (1, 0))


def _select_tiles(C, HW, itemsize, *, target_block_bytes, max_block_bytes):
    """Pick (t_c, t_hw) sized by bytes (~target_block_bytes per block).

    Prefer t_c == C so every output block (t_hw, C) is one contiguous HBM slab
    (single large writeback DMA).  t_hw is a multiple of 128 (lane-aligned
    input rows) unless it covers the full HW extent.
    """
    # Channel tile: full extent unless even a minimal (C, 128) block would
    # exceed the per-block budget; then fall back to 128-aligned channel tiles.
    if C * _LANE * itemsize <= max_block_bytes:
        t_c = C
    else:
        t_c = max(_LANE, (max_block_bytes // (_LANE * itemsize)) // _LANE * _LANE)

    # Spatial tile: grow toward the byte target (wider for bf16/int8 so the
    # strided input-DMA rows stay large and packed-sublane transposes unmasked).
    t_hw = target_block_bytes // (t_c * itemsize)
    t_hw = max(_LANE, (t_hw // _LANE) * _LANE)
    if t_hw >= HW:
        t_hw = HW  # full extent is always a legal block dimension
    return t_c, t_hw


def permute_0231(x, *, target_block_bytes=2 * _MiB, max_block_bytes=4 * _MiB):
    """Pallas equivalent of Permute(0, 2, 3, 1): (B, C, H, W) -> (B, H, W, C)."""
    B, C, H, W = x.shape
    HW = H * W
    itemsize = jnp.dtype(x.dtype).itemsize

    # Lane-sparse outputs (C < 128) would force masked partial stores plus tiny
    # strided output-DMA rows; XLA's native transpose is strictly better there.
    if C < _LANE or HW == 0 or B == 0:
        return jnp.transpose(x, (0, 2, 3, 1))

    # Wrapper-side flatten: free row-major metadata reshape (no HBM traffic).
    x3 = x.reshape(B, C, HW)

    t_c, t_hw = _select_tiles(
        C, HW, itemsize,
        target_block_bytes=target_block_bytes,
        max_block_bytes=max_block_bytes,
    )
    n_hw = pl.cdiv(HW, t_hw)   # masked edge block when HW % t_hw != 0
    n_c = pl.cdiv(C, t_c)      # masked edge block when C  % t_c  != 0

    # Largest parallel extent (HW tiles) leads the grid so a megacore (v7x)
    # shards it even when B == 1; all axes independent -> all "parallel".
    grid = (n_hw, B, n_c)

    # 2 double-buffers x (input + output) = 4 live blocks; give ~1.5-2x
    # headroom, floor at the universal 16 MiB default, cap at 32 MiB (safe on
    # v5e/v6e/v7x scoped+physical limits).
    block_bytes = t_c * t_hw * itemsize
    vmem_limit = int(min(32 * _MiB, max(16 * _MiB, 6 * block_bytes)))

    out = pl.pallas_call(
        _transpose_tile_kernel,
        out_shape=jax.ShapeDtypeStruct((B, HW, C), x.dtype),
        grid_spec=pltpu.PrefetchScalarGridSpec(
            num_scalar_prefetch=0,
            grid=grid,
            in_specs=[
                pl.BlockSpec(
                    (pl.Squeezed(), t_c, t_hw),
                    lambda s, b, c: (b, c, s),
                ),
            ],
            out_specs=pl.BlockSpec(
                (pl.Squeezed(), t_hw, t_c),
                lambda s, b, c: (b, s, c),
            ),
        ),
        compiler_params=pltpu.CompilerParams(
            dimension_semantics=("parallel", "parallel", "parallel"),
            vmem_limit_bytes=vmem_limit,
        ),
        cost_estimate=pl.CostEstimate(
            flops=0,
            transcendentals=0,
            bytes_accessed=2 * B * C * HW * itemsize,
        ),
    )(x3)

    # Unflatten HW -> (H, W): free metadata reshape on the contiguous output,
    # yielding exactly x.permute(0, 2, 3, 1).
    return out.reshape(B, H, W, C)


def permute(x, dims):
    """Forward of the `Permute` module: x.permute(*dims)."""
    dims = tuple(dims)
    if dims == (0, 2, 3, 1) and x.ndim == 4:
        return permute_0231(x)
    # TODO(synk): other permutations are pure layout ops with no single
    # lane-efficient Pallas kernel; use XLA's native transpose for them.
    return jnp.transpose(x, dims)


def _reference_permute_0231(x):
    return jnp.transpose(x, (0, 2, 3, 1))


if __name__ == "__main__":
    key = jax.random.PRNGKey(0)

    # 1) Small shape consistent with the module's typical NCHW use (C < 128
    #    -> deliberately takes the XLA-transpose fallback, per review).
    B, C, H, W = 2, 4, 16, 16
    x = jax.random.normal(key, (B, C, H, W), dtype=jnp.float32)
    out = jax.block_until_ready(permute(x, (0, 2, 3, 1)))
    assert out.shape == (B, H, W, C), out.shape
    assert out.dtype == x.dtype, out.dtype
    assert jnp.array_equal(out, _reference_permute_0231(x)), "mismatch (small-C fallback)"

    # 2) Lane-dense shape exercising the Pallas path with t_c == C, full-HW tile.
    B2, C2, H2, W2 = 2, 128, 32, 32
    x2 = jax.random.normal(jax.random.PRNGKey(0), (B2, C2, H2, W2), dtype=jnp.float32)
    out2 = jax.block_until_ready(permute(x2, (0, 2, 3, 1)))
    assert out2.shape == (B2, H2, W2, C2), out2.shape
    assert jnp.array_equal(out2, _reference_permute_0231(x2)), "mismatch (lane-dense path)"

    # 3) Non-128-divisible spatial extent with a small block budget to exercise
    #    the cdiv grid + masked edge blocks on the HW axis.
    B3, C3, H3, W3 = 1, 128, 68, 68   # HW = 4624, not a multiple of 128
    x3 = jax.random.normal(jax.random.PRNGKey(0), (B3, C3, H3, W3), dtype=jnp.float32)
    out3 = jax.block_until_ready(permute_0231(x3, target_block_bytes=256 * 1024))
    assert out3.shape == (B3, H3, W3, C3), out3.shape
    assert jnp.array_equal(out3, _reference_permute_0231(x3)), "mismatch (cdiv edge path)"

    # 4) Packed dtype (bf16) through the Pallas path.
    B4, C4, H4, W4 = 2, 128, 16, 16
    x4 = jax.random.normal(jax.random.PRNGKey(0), (B4, C4, H4, W4), dtype=jnp.bfloat16)
    out4 = jax.block_until_ready(permute(x4, (0, 2, 3, 1)))
    assert out4.shape == (B4, H4, W4, C4), out4.shape
    assert jnp.array_equal(out4, _reference_permute_0231(x4)), "mismatch (bf16 path)"

    print("KERNEL_OK")
</pallas_src>

<mosaic_0001>
module attributes {stable_mosaic.version = 11 : i64} {
  func.func @_transpose_tile_kernel(%arg0: i32, %arg1: i32, %arg2: i32, %arg3: memref<1x128x1024xf32, #tpu.memory_space<vmem>>, %arg4: memref<1x1024x128xf32, #tpu.memory_space<vmem>>) attributes {dimension_semantics = [#tpu.dimension_semantics<parallel>, #tpu.dimension_semantics<parallel>, #tpu.dimension_semantics<parallel>], iteration_bounds = array<i64: 1, 2, 1>, scalar_prefetch = 0 : i64, scratch_operands = 0 : i64, tpu.core_type = #tpu.core_type<tc>, window_params = [{transform_indices = @transform_0, window_bounds = array<i64: 1, 128, 1024>}, {transform_indices = @transform_1, window_bounds = array<i64: 1, 1024, 128>}]} {
    %c0 = arith.constant 0 : index
    %c0_0 = arith.constant 0 : index
    %c0_1 = arith.constant 0 : index
    %0 = vector.load %arg3[%c0, %c0_0, %c0_1] : memref<1x128x1024xf32, #tpu.memory_space<vmem>>, vector<1x128x1024xf32>
    %1 = vector.shape_cast %0 : vector<1x128x1024xf32> to vector<128x1024xf32>
    %2 = tpu.transpose %1, [1, 0] : vector<128x1024xf32> -> vector<1024x128xf32>
    %c0_2 = arith.constant 0 : index
    %c0_3 = arith.constant 0 : index
    %c0_4 = arith.constant 0 : index
    %3 = vector.load %arg4[%c0_2, %c0_3, %c0_4] : memref<1x1024x128xf32, #tpu.memory_space<vmem>>, vector<1x1024x128xf32>
    %4 = vector.shape_cast %3 : vector<1x1024x128xf32> to vector<1024x128xf32>
    %5 = vector.shape_cast %2 : vector<1024x128xf32> to vector<1x1024x128xf32>
    tpu.vector_store %arg4[%c0_2, %c0_3, %c0_4], %5 {strides = array<i32>} : memref<1x1024x128xf32, #tpu.memory_space<vmem>>, vector<1x1024x128xf32>,
    return
  }
  func.func @transform_0(%arg0: i32, %arg1: i32, %arg2: i32) -> (i32, i32, i32) {
    %c0_i32 = arith.constant 0 : i32
    return %arg1, %arg2, %arg0 : i32, i32, i32
  }
  func.func @transform_1(%arg0: i32, %arg1: i32, %arg2: i32) -> (i32, i32, i32) {
    %c0_i32 = arith.constant 0 : i32
    return %arg1, %arg0, %arg2 : i32, i32, i32
  }
}

</mosaic_0001>

<bundles_post_ra>
// kernel: tpu_custom_call.1
= control target key start
LH: loop header
LB: loop body
LE: loop exit
PB: predicated region body
PF: predicated region fallthrough
CT: control target
= control target key end

     0   :  { %6 = vsyncpa [#allocation3], 0  ;;  %s1412_s0 = inlined_call_operand.hbm [shape: f32[2,128,1024], index: 0, kind: input, shape index: {}]   ;;  %s1413_s1 = inlined_call_operand.hbm [shape: f32[2,1024,128], index: 1, kind: output, shape index: {}]  }
   0x1   :  { %8 = vsyncpa [#allocation3 + $0x1], 0 }
   0x2   :  { %9 = vsyncpa [#allocation4], 0 }
   0x3   :  { %11 = vsyncpa [#allocation4 + $0x1], 0  ;;  %s1001_s6 = smov 0   ;;  %s1003_s7 = smov 0  }
   0x4   :  { %s1005_s8 = smov 0   ;;  %s1007_s9 = smov 0  }
   0x5   :  { %s1009_s10 = smov 0   ;;  %s1011_s11 = smov 0  }
   0x6 LB: > { %s792_s12 = sadd.s32 4294967295, %s983_s11   ;;  %s793_s13 = sadd.s32 4294967294, %s983_s11   ;;  %s983_s11 = sphi %s1011_s11, %s17_s11   ;;  %s979_s10 = sphi %s1009_s10, %s1424_s10   ;;  %s975_s9 = sphi %s1007_s9, %s1423_s9   ;;  %s971_s8 = sphi %s1005_s8, %s1422_s8   ;;  %s967_s7 = sphi %s1003_s7, %s1421_s7   ;;  %s963_s6 = sphi %s1001_s6, %s1420_s6  }
   0x7   : > { %s32_s14 = sadd.s32 1, %s979_s10  ;;  %s47_s15 = sadd.s32 1, %s971_s8 }
   0x8   : > { %p34_p0 = scmp.ge.s32.totalorder %s32_s14, 2  ;;  %p54_p1 = scmp.ne.s32.totalorder %s971_s8, %s967_s7 }
   0x9   : > { %p55_p2 = scmp.eq.s32.totalorder %s983_s11, 0  ;;  %p60_p3 = scmp.ne.s32.totalorder %s967_s7, %s963_s6 }
   0xa   : > { %s1426_s14 = smov (%p34_p0, %s32_s14), 0  ;;  %p61_p5 = scmp.eq.s32.totalorder %s792_s12, 0 }
   0xb   : > { %p1042_p4 = por %p55_p2, %p54_p1  ;;  %s40_s17 = ssub.s32 %s979_s10, %s1426_s14 }
   0xc   : > { %p88_p6 = scmp.eq.s32.totalorder %s792_s12, 1  ;;  %p45_p7 = scmp.eq.s32.totalorder %s40_s17, 0 }
   0xd   : > { %p1048_p8 = por %p61_p5, %p60_p3  ;;  %p94_p10 = scmp.eq.s32.totalorder %s793_s13, 1 }
   0xe   : > { %p1052_p9 = por %p88_p6, %p54_p1  ;;  %p821_p13 = scmp.lt.s32.totalorder %s983_s11, 2 }
   0xf   : > { %s1057_s20 = scalar_select %p45_p7, %s971_s8, %s47_s15  }
  0x10   : > { %p1059_p11 = por %p94_p10, %p60_p3  ;;  %s114_s22 = sand.u32 1, %s971_s8  }
  0x11   : > { %s796_s23 = sshll.u32 %s114_s22, 10  ;;  %s807_s24 = sshll.u32 %s979_s10, 14 }
  0x12   : > { %s129_s27 = scalar_lea.hbm %s1412_s0, %s807_s24  ;;  %s118_s28 = scalar_lea.vmem [#allocation2], %s796_s23 }
  0x13   : > { %s130_s29 = sshll.u32 %s118_s28, 4  ;;  %p1072_p0 = pnand %p821_p13, %p1042_p4  ;;  %s131_s29 = int_to_ptr.vmem [resolvable:$true] %s130_s29 }
  0x14   : > { %p799_p1 = scmp.ge.s32.totalorder %s983_s11, 1  ;;  %s115_s2 = scalar_lea.sflag [#allocation3], %s114_s22 }
  0x15   : > { %p877_p2 = pneg %p1072_p0  ;;  %s888_s3 = scalar_lea.vmem %s131_s29, 16384 }
  0x16   : > { %p889_p3 = scmp.ne.s32.totalorder %s131_s29, %s888_s3  ;;  %s985_s4 = smov [#allocation2]  }
  0x17   : > { %s893_s5 = sshll.u32 %s985_s4, 4  ;;  %s894_s5 = int_to_ptr.vmem [resolvable:$false] %s893_s5 }
  0x18   : > { %p891_p5 = pnand %p889_p3, %p877_p2  ;;  %s895_s12 = scalar_lea.vmem %s894_s5, 32768 }
  0x19   : > { %p896_p7 = scmp.lt.s32.totalorder %s131_s29, %s894_s5  ;;  %p897_p10 = scmp.lt.s32.totalorder %s895_s12, %s888_s3 }
  0x1a   : > { %p892_p6 = pneg %p891_p5 }
  0x1b   : > { %p898_p12 = por %p897_p10, %p896_p7 }
  0x1d   : > { %p899_p4 = pnand %p898_p12, %p892_p6 }
  0x1f   : > { %902 = shalt.err (!%p899_p4)
}
  0x20   : > { %s986_s13 = smov 1024   ;;  %s987_s15 = smov 64  }
  0x21   : > { %816 = dma.hbm_to_vmem [thread:$0]  (!%p1072_p0), %s129_s27, 16384, %s131_s29, %s115_s2, %s986_s13, %s986_s13, %s987_s15  }
  0x22   : > { %p138_p13 = scmp.lt.s32.totalorder %s983_s11, 3 }
  0x24   : > { %p139_p2 = pnand %p799_p1, %p138_p13 }
  0x25   : > { %s1085_s16 = sand.u32 (!%p139_p2), 1, %s967_s7  }
  0x26   : > { %142 = sbr.rel (%p139_p2) target bundleno = 436 (0x1b4), region = 24  ;;  %s800_s17 = sshll.u32 (!%p139_p2), %s1085_s16, 10 }
  0x27   : > { %s145_s22 = scalar_lea.sflag (!%p139_p2), [#allocation3], %s1085_s16  ;;  %s1091_s23 = scalar_lea.vmem (!%p139_p2), [#allocation2], %s800_s17 }
  0x2b   : > { %954 = dma.done.wait (%p1048_p8), %s145_s22, 16384  }
  0x2c   : > { %956 = vsyncadd (%p1048_p8), %s145_s22, 4294950912  ;;  %v171_v0 = vld [vmem:[%s1091_s23 + $0x8] sm:$0xff]  ;;  %v170_v1 = vld [vmem:[%s1091_s23] sm:$0xff]  ;;  %s1163_s18 = scalar_lea.vmem [#allocation5], %s800_s17  ;;  %s808_s24 = sshll.u32 %s975_s9, 14 }
  0x2d   : > { %330 = vxpose.xlu1.b32.start [1/16] %v171_v0, 128  ;;  %298 = vxpose.xlu0.b32.start [1/16] %v170_v1, 128  ;;  %v179_v2 = vld [vmem:[%s1091_s23 + $0x48] sm:$0xff]  ;;  %v178_v3 = vld [vmem:[%s1091_s23 + $0x40] sm:$0xff]  ;;  %v173_v32 = vld [vmem:[%s1091_s23 + $0x18] sm:$0xff]  ;;  %s699_s25 = sshll.u32 %s1163_s18, 4  ;;  %s1360_s28 = scalar_lea.hbm %s1413_s1, %s808_s24  ;;  %s1362_s25 = int_to_ptr.vmem [resolvable:$true] %s699_s25 }
  0x2e   : > { %v187_v4 = vld [vmem:[%s1091_s23 + $0x88] sm:$0xff]  ;;  %v186_v5 = vld [vmem:[%s1091_s23 + $0x80] sm:$0xff]  ;;  %v172_v33 = vld [vmem:[%s1091_s23 + $0x10] sm:$0xff]  ;;  %s683_s9 = scalar_lea.sflag [#allocation4], %s1085_s16  ;;  %s903_s29 = scalar_lea.vmem %s1362_s25, 16384 }
  0x2f   : > { %v195_v6 = vld [vmem:[%s1091_s23 + $0xc8] sm:$0xff]  ;;  %v194_v7 = vld [vmem:[%s1091_s23 + $0xc0] sm:$0xff]  ;;  %v181_v34 = vld [vmem:[%s1091_s23 + $0x58] sm:$0xff]  ;;  %p904_p8 = scmp.ne.s32.totalorder %s1362_s25, %s903_s29  ;;  %s988_s30 = smov [#allocation5]  }
  0x30   : > { %v203_v8 = vld [vmem:[%s1091_s23 + $0x108] sm:$0xff]  ;;  %v202_v9 = vld [vmem:[%s1091_s23 + $0x100] sm:$0xff]  ;;  %v180_v35 = vld [vmem:[%s1091_s23 + $0x50] sm:$0xff]  ;;  %s907_s2 = sshll.u32 %s988_s30, 4  ;;  %s908_s2 = int_to_ptr.vmem [resolvable:$false] %s907_s2 }
  0x31   : > { %331 = vxpose.xlu1.b32.cont [2/16] %v179_v2, 128  ;;  %299 = vxpose.xlu0.b32.cont [2/16] %v178_v3, 128  ;;  %v211_v10 = vld [vmem:[%s1091_s23 + $0x148] sm:$0xff]  ;;  %v210_v11 = vld [vmem:[%s1091_s23 + $0x140] sm:$0xff]  ;;  %v189_v36 = vld [vmem:[%s1091_s23 + $0x98] sm:$0xff]  ;;  %p905_p12 = pnand %p904_p8, %p1052_p9  ;;  %s909_s3 = scalar_lea.vmem %s908_s2, 32768 }
  0x32   : > { %v219_v12 = vld [vmem:[%s1091_s23 + $0x188] sm:$0xff]  ;;  %v218_v13 = vld [vmem:[%s1091_s23 + $0x180] sm:$0xff]  ;;  %v188_v37 = vld [vmem:[%s1091_s23 + $0x90] sm:$0xff]  ;;  %p910_p1 = scmp.lt.s32.totalorder %s1362_s25, %s908_s2  ;;  %p911_p3 = scmp.lt.s32.totalorder %s909_s3, %s903_s29 }
  0x33   : > { %v227_v14 = vld [vmem:[%s1091_s23 + $0x1c8] sm:$0xff]  ;;  %v226_v15 = vld [vmem:[%s1091_s23 + $0x1c0] sm:$0xff]  ;;  %v197_v38 = vld [vmem:[%s1091_s23 + $0xd8] sm:$0xff]  ;;  %p906_p0 = pneg %p905_p12 }
  0x34   : > { %v235_v16 = vld [vmem:[%s1091_s23 + $0x208] sm:$0xff]  ;;  %v234_v17 = vld [vmem:[%s1091_s23 + $0x200] sm:$0xff]  ;;  %v196_v39 = vld [vmem:[%s1091_s23 + $0xd0] sm:$0xff]  ;;  %p912_p5 = por %p911_p3, %p910_p1 }
  0x35   : > { %332 = vxpose.xlu1.b32.cont [3/16] %v187_v4, 128  ;;  %300 = vxpose.xlu0.b32.cont [3/16] %v186_v5, 128  ;;  %v243_v18 = vld [vmem:[%s1091_s23 + $0x248] sm:$0xff]  ;;  %v242_v19 = vld [vmem:[%s1091_s23 + $0x240] sm:$0xff]  ;;  %v205_v40 = vld [vmem:[%s1091_s23 + $0x118] sm:$0xff] }
  0x36   : > { %v251_v20 = vld [vmem:[%s1091_s23 + $0x288] sm:$0xff]  ;;  %v250_v21 = vld [vmem:[%s1091_s23 + $0x280] sm:$0xff]  ;;  %v204_v41 = vld [vmem:[%s1091_s23 + $0x110] sm:$0xff]  ;;  %p913_p6 = pnand %p912_p5, %p906_p0 }
  0x37   : > { %v259_v22 = vld [vmem:[%s1091_s23 + $0x2c8] sm:$0xff]  ;;  %v258_v23 = vld [vmem:[%s1091_s23 + $0x2c0] sm:$0xff]  ;;  %v213_v42 = vld [vmem:[%s1091_s23 + $0x158] sm:$0xff] }
  0x38   : > { %v267_v24 = vld [vmem:[%s1091_s23 + $0x308] sm:$0xff]  ;;  %v266_v25 = vld [vmem:[%s1091_s23 + $0x300] sm:$0xff]  ;;  %v212_v43 = vld [vmem:[%s1091_s23 + $0x150] sm:$0xff] }
  0x39   : > { %333 = vxpose.xlu1.b32.cont [4/16] %v195_v6, 128  ;;  %301 = vxpose.xlu0.b32.cont [4/16] %v194_v7, 128  ;;  %v275_v26 = vld [vmem:[%s1091_s23 + $0x348] sm:$0xff]  ;;  %v274_v27 = vld [vmem:[%s1091_s23 + $0x340] sm:$0xff]  ;;  %v221_v44 = vld [vmem:[%s1091_s23 + $0x198] sm:$0xff] }
  0x3a   : > { %v283_v28 = vld [vmem:[%s1091_s23 + $0x388] sm:$0xff]  ;;  %v282_v29 = vld [vmem:[%s1091_s23 + $0x380] sm:$0xff]  ;;  %v220_v45 = vld [vmem:[%s1091_s23 + $0x190] sm:$0xff] }
  0x3b   : > { %v291_v30 = vld [vmem:[%s1091_s23 + $0x3c8] sm:$0xff]  ;;  %v290_v31 = vld [vmem:[%s1091_s23 + $0x3c0] sm:$0xff]  ;;  %v229_v46 = vld [vmem:[%s1091_s23 + $0x1d8] sm:$0xff] }
  0x3c   : > { %v228_v47 = vld [vmem:[%s1091_s23 + $0x1d0] sm:$0xff]  ;;  %v237_v48 = vld [vmem:[%s1091_s23 + $0x218] sm:$0xff]  ;;  %v175_v2 = vld [vmem:[%s1091_s23 + $0x28] sm:$0xff] }
  0x3d   : > { %334 = vxpose.xlu1.b32.cont [5/16] %v203_v8, 128  ;;  %302 = vxpose.xlu0.b32.cont [5/16] %v202_v9, 128  ;;  %v236_v49 = vld [vmem:[%s1091_s23 + $0x210] sm:$0xff]  ;;  %v245_v50 = vld [vmem:[%s1091_s23 + $0x258] sm:$0xff]  ;;  %v174_v3 = vld [vmem:[%s1091_s23 + $0x20] sm:$0xff] }
  0x3e   : > { %v244_v51 = vld [vmem:[%s1091_s23 + $0x250] sm:$0xff]  ;;  %v253_v52 = vld [vmem:[%s1091_s23 + $0x298] sm:$0xff]  ;;  %v183_v6 = vld [vmem:[%s1091_s23 + $0x68] sm:$0xff] }
  0x3f   : > { %v252_v53 = vld [vmem:[%s1091_s23 + $0x290] sm:$0xff]  ;;  %v261_v54 = vld [vmem:[%s1091_s23 + $0x2d8] sm:$0xff]  ;;  %v182_v7 = vld [vmem:[%s1091_s23 + $0x60] sm:$0xff] }
  0x40   : > { %v260_v55 = vld [vmem:[%s1091_s23 + $0x2d0] sm:$0xff]  ;;  %v269_v56 = vld [vmem:[%s1091_s23 + $0x318] sm:$0xff] }
  0x41   : > { %335 = vxpose.xlu1.b32.cont [6/16] %v211_v10, 128  ;;  %303 = vxpose.xlu0.b32.cont [6/16] %v210_v11, 128  ;;  %v268_v57 = vld [vmem:[%s1091_s23 + $0x310] sm:$0xff]  ;;  %v277_v58 = vld [vmem:[%s1091_s23 + $0x358] sm:$0xff]  ;;  %v191_v10 = vld [vmem:[%s1091_s23 + $0xa8] sm:$0xff] }
  0x42   : > { %v276_v59 = vld [vmem:[%s1091_s23 + $0x350] sm:$0xff]  ;;  %v285_v60 = vld [vmem:[%s1091_s23 + $0x398] sm:$0xff]  ;;  %v190_v11 = vld [vmem:[%s1091_s23 + $0xa0] sm:$0xff] }
  0x43   : > { %v284_v61 = vld [vmem:[%s1091_s23 + $0x390] sm:$0xff]  ;;  %v293_v62 = vld [vmem:[%s1091_s23 + $0x3d8] sm:$0xff] }
  0x44   : > { %v292_v63 = vld [vmem:[%s1091_s23 + $0x3d0] sm:$0xff] }
  0x45   : > { %336 = vxpose.xlu1.b32.cont [7/16] %v219_v12, 128  ;;  %304 = vxpose.xlu0.b32.cont [7/16] %v218_v13, 128 }
  0x49   : > { %337 = vxpose.xlu1.b32.cont [8/16] %v227_v14, 128  ;;  %305 = vxpose.xlu0.b32.cont [8/16] %v226_v15, 128  ;;  %v199_v14 = vld [vmem:[%s1091_s23 + $0xe8] sm:$0xff]  ;;  %v198_v15 = vld [vmem:[%s1091_s23 + $0xe0] sm:$0xff] }
  0x4d   : > { %338 = vxpose.xlu1.b32.cont [9/16] %v235_v16, 128  ;;  %306 = vxpose.xlu0.b32.cont [9/16] %v234_v17, 128 }
  0x51   : > { %339 = vxpose.xlu1.b32.cont [10/16] %v243_v18, 128  ;;  %307 = vxpose.xlu0.b32.cont [10/16] %v242_v19, 128  ;;  %v207_v18 = vld [vmem:[%s1091_s23 + $0x128] sm:$0xff]  ;;  %v206_v19 = vld [vmem:[%s1091_s23 + $0x120] sm:$0xff] }
  0x55   : > { %340 = vxpose.xlu1.b32.cont [11/16] %v251_v20, 128  ;;  %308 = vxpose.xlu0.b32.cont [11/16] %v250_v21, 128 }
  0x59   : > { %341 = vxpose.xlu1.b32.cont [12/16] %v259_v22, 128  ;;  %309 = vxpose.xlu0.b32.cont [12/16] %v258_v23, 128  ;;  %v215_v22 = vld [vmem:[%s1091_s23 + $0x168] sm:$0xff]  ;;  %v214_v23 = vld [vmem:[%s1091_s23 + $0x160] sm:$0xff] }
  0x5d   : > { %342 = vxpose.xlu1.b32.cont [13/16] %v267_v24, 128  ;;  %310 = vxpose.xlu0.b32.cont [13/16] %v266_v25, 128 }
  0x61   : > { %343 = vxpose.xlu1.b32.cont [14/16] %v275_v26, 128  ;;  %311 = vxpose.xlu0.b32.cont [14/16] %v274_v27, 128  ;;  %v223_v26 = vld [vmem:[%s1091_s23 + $0x1a8] sm:$0xff]  ;;  %v222_v27 = vld [vmem:[%s1091_s23 + $0x1a0] sm:$0xff] }
  0x65   : > { %344 = vxpose.xlu1.b32.cont [15/16] %v283_v28, 128  ;;  %312 = vxpose.xlu0.b32.cont [15/16] %v282_v29, 128 }
  0x69   : > { %345 = vxpose.xlu1.b32.end [16/16] %v291_v30, 128  ;;  %313 = vxpose.xlu0.b32.end [16/16] %v290_v31, 128  ;;  %v231_v30 = vld [vmem:[%s1091_s23 + $0x1e8] sm:$0xff]  ;;  %v230_v31 = vld [vmem:[%s1091_s23 + $0x1e0] sm:$0xff] }
  0x6d   : > { %394 = vxpose.xlu1.b32.start [1/16] %v173_v32, 128  ;;  %362 = vxpose.xlu0.b32.start [1/16] %v172_v33, 128 }
  0x71   : > { %395 = vxpose.xlu1.b32.cont [2/16] %v181_v34, 128  ;;  %363 = vxpose.xlu0.b32.cont [2/16] %v180_v35, 128  ;;  %v239_v34 = vld [vmem:[%s1091_s23 + $0x228] sm:$0xff]  ;;  %v238_v35 = vld [vmem:[%s1091_s23 + $0x220] sm:$0xff] }
  0x75   : > { %396 = vxpose.xlu1.b32.cont [3/16] %v189_v36, 128  ;;  %364 = vxpose.xlu0.b32.cont [3/16] %v188_v37, 128 }
  0x79   : > { %397 = vxpose.xlu1.b32.cont [4/16] %v197_v38, 128  ;;  %365 = vxpose.xlu0.b32.cont [4/16] %v196_v39, 128  ;;  %v247_v38 = vld [vmem:[%s1091_s23 + $0x268] sm:$0xff]  ;;  %v246_v39 = vld [vmem:[%s1091_s23 + $0x260] sm:$0xff] }
  0x7d   : > { %398 = vxpose.xlu1.b32.cont [5/16] %v205_v40, 128  ;;  %366 = vxpose.xlu0.b32.cont [5/16] %v204_v41, 128 }
  0x81   : > { %399 = vxpose.xlu1.b32.cont [6/16] %v213_v42, 128  ;;  %367 = vxpose.xlu0.b32.cont [6/16] %v212_v43, 128  ;;  %v255_v42 = vld [vmem:[%s1091_s23 + $0x2a8] sm:$0xff]  ;;  %v254_v43 = vld [vmem:[%s1091_s23 + $0x2a0] sm:$0xff] }
  0x85   : > { %400 = vxpose.xlu1.b32.cont [7/16] %v221_v44, 128  ;;  %368 = vxpose.xlu0.b32.cont [7/16] %v220_v45, 128 }
  0x89   : > { %401 = vxpose.xlu1.b32.cont [8/16] %v229_v46, 128  ;;  %369 = vxpose.xlu0.b32.cont [8/16] %v228_v47, 128  ;;  %v263_v46 = vld [vmem:[%s1091_s23 + $0x2e8] sm:$0xff]  ;;  %v262_v47 = vld [vmem:[%s1091_s23 + $0x2e0] sm:$0xff] }
  0x8d   : > { %402 = vxpose.xlu1.b32.cont [9/16] %v237_v48, 128  ;;  %370 = vxpose.xlu0.b32.cont [9/16] %v236_v49, 128 }
  0x91   : > { %403 = vxpose.xlu1.b32.cont [10/16] %v245_v50, 128  ;;  %371 = vxpose.xlu0.b32.cont [10/16] %v244_v51, 128  ;;  %v271_v50 = vld [vmem:[%s1091_s23 + $0x328] sm:$0xff]  ;;  %v270_v51 = vld [vmem:[%s1091_s23 + $0x320] sm:$0xff] }
  0x95   : > { %404 = vxpose.xlu1.b32.cont [11/16] %v253_v52, 128  ;;  %372 = vxpose.xlu0.b32.cont [11/16] %v252_v53, 128 }
  0x99   : > { %405 = vxpose.xlu1.b32.cont [12/16] %v261_v54, 128  ;;  %373 = vxpose.xlu0.b32.cont [12/16] %v260_v55, 128  ;;  %v279_v54 = vld [vmem:[%s1091_s23 + $0x368] sm:$0xff]  ;;  %v278_v55 = vld [vmem:[%s1091_s23 + $0x360] sm:$0xff] }
  0x9d   : > { %406 = vxpose.xlu1.b32.cont [13/16] %v269_v56, 128  ;;  %374 = vxpose.xlu0.b32.cont [13/16] %v268_v57, 128 }
  0xa1   : > { %407 = vxpose.xlu1.b32.cont [14/16] %v277_v58, 128  ;;  %375 = vxpose.xlu0.b32.cont [14/16] %v276_v59, 128  ;;  %v287_v58 = vld [vmem:[%s1091_s23 + $0x3a8] sm:$0xff]  ;;  %v286_v59 = vld [vmem:[%s1091_s23 + $0x3a0] sm:$0xff] }
  0xa5   : > { %408 = vxpose.xlu1.b32.cont [15/16] %v285_v60, 128  ;;  %376 = vxpose.xlu0.b32.cont [15/16] %v284_v61, 128 }
  0xa9   : > { %409 = vxpose.xlu1.b32.end [16/16] %v293_v62, 128  ;;  %v346_v0 = vpop.trf.xlu1  ;;  %377 = vxpose.xlu0.b32.end [16/16] %v292_v63, 128  ;;  %v314_v1 = vpop.trf.xlu0  ;;  %v295_v62 = vld [vmem:[%s1091_s23 + $0x3e8] sm:$0xff]  ;;  %v294_v63 = vld [vmem:[%s1091_s23 + $0x3e0] sm:$0xff] }
  0xaa   : > { %570 = vst [vmem:[%s1163_s18 + $0x80] sm:$0xff] %v346_v0  ;;  %554 = vst [vmem:[%s1163_s18] sm:$0xff] %v314_v1 }
  0xad   : > { %458 = vxpose.xlu1.b32.start [1/16] %v175_v2, 128  ;;  %v347_v4 = vpop.trf.xlu1  ;;  %426 = vxpose.xlu0.b32.start [1/16] %v174_v3, 128  ;;  %v315_v5 = vpop.trf.xlu0  ;;  %v177_v2 = vld [vmem:[%s1091_s23 + $0x38] sm:$0xff]  ;;  %v176_v3 = vld [vmem:[%s1091_s23 + $0x30] sm:$0xff] }
  0xae   : > { %571 = vst [vmem:[%s1163_s18 + $0x88] sm:$0xff] %v347_v4  ;;  %555 = vst [vmem:[%s1163_s18 + $0x8] sm:$0xff] %v315_v5 }
  0xb1   : > { %459 = vxpose.xlu1.b32.cont [2/16] %v183_v6, 128  ;;  %v348_v8 = vpop.trf.xlu1  ;;  %427 = vxpose.xlu0.b32.cont [2/16] %v182_v7, 128  ;;  %v316_v9 = vpop.trf.xlu0  ;;  %v185_v6 = vld [vmem:[%s1091_s23 + $0x78] sm:$0xff]  ;;  %v184_v7 = vld [vmem:[%s1091_s23 + $0x70] sm:$0xff] }
  0xb2   : > { %572 = vst [vmem:[%s1163_s18 + $0x90] sm:$0xff] %v348_v8  ;;  %556 = vst [vmem:[%s1163_s18 + $0x10] sm:$0xff] %v316_v9 }
  0xb5   : > { %460 = vxpose.xlu1.b32.cont [3/16] %v191_v10, 128  ;;  %v349_v12 = vpop.trf.xlu1  ;;  %428 = vxpose.xlu0.b32.cont [3/16] %v190_v11, 128  ;;  %v317_v13 = vpop.trf.xlu0  ;;  %v193_v10 = vld [vmem:[%s1091_s23 + $0xb8] sm:$0xff]  ;;  %v192_v11 = vld [vmem:[%s1091_s23 + $0xb0] sm:$0xff] }
  0xb6   : > { %573 = vst [vmem:[%s1163_s18 + $0x98] sm:$0xff] %v349_v12  ;;  %557 = vst [vmem:[%s1163_s18 + $0x18] sm:$0xff] %v317_v13 }
  0xb9   : > { %461 = vxpose.xlu1.b32.cont [4/16] %v199_v14, 128  ;;  %v350_v16 = vpop.trf.xlu1  ;;  %429 = vxpose.xlu0.b32.cont [4/16] %v198_v15, 128  ;;  %v318_v17 = vpop.trf.xlu0  ;;  %v201_v14 = vld [vmem:[%s1091_s23 + $0xf8] sm:$0xff]  ;;  %v200_v15 = vld [vmem:[%s1091_s23 + $0xf0] sm:$0xff] }
  0xba   : > { %574 = vst [vmem:[%s1163_s18 + $0xa0] sm:$0xff] %v350_v16  ;;  %558 = vst [vmem:[%s1163_s18 + $0x20] sm:$0xff] %v318_v17 }
  0xbd   : > { %462 = vxpose.xlu1.b32.cont [5/16] %v207_v18, 128  ;;  %v351_v20 = vpop.trf.xlu1  ;;  %430 = vxpose.xlu0.b32.cont [5/16] %v206_v19, 128  ;;  %v319_v21 = vpop.trf.xlu0  ;;  %v209_v18 = vld [vmem:[%s1091_s23 + $0x138] sm:$0xff]  ;;  %v208_v19 = vld [vmem:[%s1091_s23 + $0x130] sm:$0xff] }
  0xbe   : > { %575 = vst [vmem:[%s1163_s18 + $0xa8] sm:$0xff] %v351_v20  ;;  %559 = vst [vmem:[%s1163_s18 + $0x28] sm:$0xff] %v319_v21 }
  0xc1   : > { %463 = vxpose.xlu1.b32.cont [6/16] %v215_v22, 128  ;;  %v352_v24 = vpop.trf.xlu1  ;;  %431 = vxpose.xlu0.b32.cont [6/16] %v214_v23, 128  ;;  %v320_v25 = vpop.trf.xlu0  ;;  %v217_v22 = vld [vmem:[%s1091_s23 + $0x178] sm:$0xff]  ;;  %v216_v23 = vld [vmem:[%s1091_s23 + $0x170] sm:$0xff] }
  0xc2   : > { %576 = vst [vmem:[%s1163_s18 + $0xb0] sm:$0xff] %v352_v24  ;;  %560 = vst [vmem:[%s1163_s18 + $0x30] sm:$0xff] %v320_v25 }
  0xc5   : > { %464 = vxpose.xlu1.b32.cont [7/16] %v223_v26, 128  ;;  %v353_v28 = vpop.trf.xlu1  ;;  %432 = vxpose.xlu0.b32.cont [7/16] %v222_v27, 128  ;;  %v321_v29 = vpop.trf.xlu0  ;;  %v225_v26 = vld [vmem:[%s1091_s23 + $0x1b8] sm:$0xff]  ;;  %v224_v27 = vld [vmem:[%s1091_s23 + $0x1b0] sm:$0xff] }
  0xc6   : > { %577 = vst [vmem:[%s1163_s18 + $0xb8] sm:$0xff] %v353_v28  ;;  %561 = vst [vmem:[%s1163_s18 + $0x38] sm:$0xff] %v321_v29 }
  0xc9   : > { %465 = vxpose.xlu1.b32.cont [8/16] %v231_v30, 128  ;;  %v354_v32 = vpop.trf.xlu1  ;;  %433 = vxpose.xlu0.b32.cont [8/16] %v230_v31, 128  ;;  %v322_v33 = vpop.trf.xlu0  ;;  %v233_v30 = vld [vmem:[%s1091_s23 + $0x1f8] sm:$0xff]  ;;  %v232_v31 = vld [vmem:[%s1091_s23 + $0x1f0] sm:$0xff] }
  0xca   : > { %578 = vst [vmem:[%s1163_s18 + $0xc0] sm:$0xff] %v354_v32  ;;  %562 = vst [vmem:[%s1163_s18 + $0x40] sm:$0xff] %v322_v33 }
  0xcd   : > { %466 = vxpose.xlu1.b32.cont [9/16] %v239_v34, 128  ;;  %v355_v36 = vpop.trf.xlu1  ;;  %434 = vxpose.xlu0.b32.cont [9/16] %v238_v35, 128  ;;  %v323_v37 = vpop.trf.xlu0  ;;  %v241_v34 = vld [vmem:[%s1091_s23 + $0x238] sm:$0xff]  ;;  %v240_v35 = vld [vmem:[%s1091_s23 + $0x230] sm:$0xff] }
  0xce   : > { %579 = vst [vmem:[%s1163_s18 + $0xc8] sm:$0xff] %v355_v36  ;;  %563 = vst [vmem:[%s1163_s18 + $0x48] sm:$0xff] %v323_v37 }
  0xd1   : > { %467 = vxpose.xlu1.b32.cont [10/16] %v247_v38, 128  ;;  %v356_v40 = vpop.trf.xlu1  ;;  %435 = vxpose.xlu0.b32.cont [10/16] %v246_v39, 128  ;;  %v324_v41 = vpop.trf.xlu0  ;;  %v249_v38 = vld [vmem:[%s1091_s23 + $0x278] sm:$0xff]  ;;  %v248_v39 = vld [vmem:[%s1091_s23 + $0x270] sm:$0xff] }
  0xd2   : > { %580 = vst [vmem:[%s1163_s18 + $0xd0] sm:$0xff] %v356_v40  ;;  %564 = vst [vmem:[%s1163_s18 + $0x50] sm:$0xff] %v324_v41 }
  0xd5   : > { %468 = vxpose.xlu1.b32.cont [11/16] %v255_v42, 128  ;;  %v357_v44 = vpop.trf.xlu1  ;;  %436 = vxpose.xlu0.b32.cont [11/16] %v254_v43, 128  ;;  %v325_v45 = vpop.trf.xlu0  ;;  %v257_v42 = vld [vmem:[%s1091_s23 + $0x2b8] sm:$0xff]  ;;  %v256_v43 = vld [vmem:[%s1091_s23 + $0x2b0] sm:$0xff] }
  0xd6   : > { %581 = vst [vmem:[%s1163_s18 + $0xd8] sm:$0xff] %v357_v44  ;;  %565 = vst [vmem:[%s1163_s18 + $0x58] sm:$0xff] %v325_v45 }
  0xd9   : > { %469 = vxpose.xlu1.b32.cont [12/16] %v263_v46, 128  ;;  %v358_v48 = vpop.trf.xlu1  ;;  %437 = vxpose.xlu0.b32.cont [12/16] %v262_v47, 128  ;;  %v326_v49 = vpop.trf.xlu0  ;;  %v265_v46 = vld [vmem:[%s1091_s23 + $0x2f8] sm:$0xff]  ;;  %v264_v47 = vld [vmem:[%s1091_s23 + $0x2f0] sm:$0xff] }
  0xda   : > { %582 = vst [vmem:[%s1163_s18 + $0xe0] sm:$0xff] %v358_v48  ;;  %566 = vst [vmem:[%s1163_s18 + $0x60] sm:$0xff] %v326_v49 }
  0xdd   : > { %470 = vxpose.xlu1.b32.cont [13/16] %v271_v50, 128  ;;  %v359_v52 = vpop.trf.xlu1  ;;  %438 = vxpose.xlu0.b32.cont [13/16] %v270_v51, 128  ;;  %v327_v53 = vpop.trf.xlu0  ;;  %v273_v50 = vld [vmem:[%s1091_s23 + $0x338] sm:$0xff]  ;;  %v272_v51 = vld [vmem:[%s1091_s23 + $0x330] sm:$0xff] }
  0xde   : > { %583 = vst [vmem:[%s1163_s18 + $0xe8] sm:$0xff] %v359_v52  ;;  %567 = vst [vmem:[%s1163_s18 + $0x68] sm:$0xff] %v327_v53 }
  0xe1   : > { %471 = vxpose.xlu1.b32.cont [14/16] %v279_v54, 128  ;;  %v360_v56 = vpop.trf.xlu1  ;;  %439 = vxpose.xlu0.b32.cont [14/16] %v278_v55, 128  ;;  %v328_v57 = vpop.trf.xlu0  ;;  %v281_v54 = vld [vmem:[%s1091_s23 + $0x378] sm:$0xff]  ;;  %v280_v55 = vld [vmem:[%s1091_s23 + $0x370] sm:$0xff] }
  0xe2   : > { %584 = vst [vmem:[%s1163_s18 + $0xf0] sm:$0xff] %v360_v56  ;;  %568 = vst [vmem:[%s1163_s18 + $0x70] sm:$0xff] %v328_v57 }
  0xe5   : > { %472 = vxpose.xlu1.b32.cont [15/16] %v287_v58, 128  ;;  %v361_v60 = vpop.trf.xlu1  ;;  %440 = vxpose.xlu0.b32.cont [15/16] %v286_v59, 128  ;;  %v329_v61 = vpop.trf.xlu0  ;;  %v289_v58 = vld [vmem:[%s1091_s23 + $0x3b8] sm:$0xff]  ;;  %v288_v59 = vld [vmem:[%s1091_s23 + $0x3b0] sm:$0xff] }
  0xe6   : > { %585 = vst [vmem:[%s1163_s18 + $0xf8] sm:$0xff] %v361_v60  ;;  %569 = vst [vmem:[%s1163_s18 + $0x78] sm:$0xff] %v329_v61 }
  0xe9   : > { %473 = vxpose.xlu1.b32.end [16/16] %v295_v62, 128  ;;  %v410_v0 = vpop.trf.xlu1  ;;  %441 = vxpose.xlu0.b32.end [16/16] %v294_v63, 128  ;;  %v378_v1 = vpop.trf.xlu0  ;;  %v297_v62 = vld [vmem:[%s1091_s23 + $0x3f8] sm:$0xff]  ;;  %v296_v63 = vld [vmem:[%s1091_s23 + $0x3f0] sm:$0xff] }
  0xea   : > { %602 = vst [vmem:[%s1163_s18 + $0x180] sm:$0xff] %v410_v0  ;;  %586 = vst [vmem:[%s1163_s18 + $0x100] sm:$0xff] %v378_v1 }
  0xed   : > { %522 = vxpose.xlu1.b32.start [1/16] %v177_v2, 128  ;;  %v411_v4 = vpop.trf.xlu1  ;;  %490 = vxpose.xlu0.b32.start [1/16] %v176_v3, 128  ;;  %v379_v5 = vpop.trf.xlu0 }
  0xee   : > { %603 = vst [vmem:[%s1163_s18 + $0x188] sm:$0xff] %v411_v4  ;;  %587 = vst [vmem:[%s1163_s18 + $0x108] sm:$0xff] %v379_v5 }
  0xf1   : > { %523 = vxpose.xlu1.b32.cont [2/16] %v185_v6, 128  ;;  %v412_v8 = vpop.trf.xlu1  ;;  %491 = vxpose.xlu0.b32.cont [2/16] %v184_v7, 128  ;;  %v380_v9 = vpop.trf.xlu0 }
  0xf2   : > { %604 = vst [vmem:[%s1163_s18 + $0x190] sm:$0xff] %v412_v8  ;;  %588 = vst [vmem:[%s1163_s18 + $0x110] sm:$0xff] %v380_v9 }
  0xf5   : > { %524 = vxpose.xlu1.b32.cont [3/16] %v193_v10, 128  ;;  %v413_v12 = vpop.trf.xlu1  ;;  %492 = vxpose.xlu0.b32.cont [3/16] %v192_v11, 128  ;;  %v381_v13 = vpop.trf.xlu0 }
  0xf6   : > { %605 = vst [vmem:[%s1163_s18 + $0x198] sm:$0xff] %v413_v12  ;;  %589 = vst [vmem:[%s1163_s18 + $0x118] sm:$0xff] %v381_v13 }
  0xf9   : > { %525 = vxpose.xlu1.b32.cont [4/16] %v201_v14, 128  ;;  %v414_v16 = vpop.trf.xlu1  ;;  %493 = vxpose.xlu0.b32.cont [4/16] %v200_v15, 128  ;;  %v382_v17 = vpop.trf.xlu0 }
  0xfa   : > { %606 = vst [vmem:[%s1163_s18 + $0x1a0] sm:$0xff] %v414_v16  ;;  %590 = vst [vmem:[%s1163_s18 + $0x120] sm:$0xff] %v382_v17 }
  0xfd   : > { %526 = vxpose.xlu1.b32.cont [5/16] %v209_v18, 128  ;;  %v415_v20 = vpop.trf.xlu1  ;;  %494 = vxpose.xlu0.b32.cont [5/16] %v208_v19, 128  ;;  %v383_v21 = vpop.trf.xlu0 }
  0xfe   : > { %607 = vst [vmem:[%s1163_s18 + $0x1a8] sm:$0xff] %v415_v20  ;;  %591 = vst [vmem:[%s1163_s18 + $0x128] sm:$0xff] %v383_v21 }
 0x101   : > { %527 = vxpose.xlu1.b32.cont [6/16] %v217_v22, 128  ;;  %v416_v24 = vpop.trf.xlu1  ;;  %495 = vxpose.xlu0.b32.cont [6/16] %v216_v23, 128  ;;  %v384_v25 = vpop.trf.xlu0 }
 0x102   : > { %608 = vst [vmem:[%s1163_s18 + $0x1b0] sm:$0xff] %v416_v24  ;;  %592 = vst [vmem:[%s1163_s18 + $0x130] sm:$0xff] %v384_v25 }
 0x105   : > { %528 = vxpose.xlu1.b32.cont [7/16] %v225_v26, 128  ;;  %v417_v28 = vpop.trf.xlu1  ;;  %496 = vxpose.xlu0.b32.cont [7/16] %v224_v27, 128  ;;  %v385_v29 = vpop.trf.xlu0 }
 0x106   : > { %609 = vst [vmem:[%s1163_s18 + $0x1b8] sm:$0xff] %v417_v28  ;;  %593 = vst [vmem:[%s1163_s18 + $0x138] sm:$0xff] %v385_v29 }
 0x109   : > { %529 = vxpose.xlu1.b32.cont [8/16] %v233_v30, 128  ;;  %v418_v32 = vpop.trf.xlu1  ;;  %497 = vxpose.xlu0.b32.cont [8/16] %v232_v31, 128  ;;  %v386_v33 = vpop.trf.xlu0 }
 0x10a   : > { %610 = vst [vmem:[%s1163_s18 + $0x1c0] sm:$0xff] %v418_v32  ;;  %594 = vst [vmem:[%s1163_s18 + $0x140] sm:$0xff] %v386_v33 }
 0x10d   : > { %530 = vxpose.xlu1.b32.cont [9/16] %v241_v34, 128  ;;  %v419_v36 = vpop.trf.xlu1  ;;  %498 = vxpose.xlu0.b32.cont [9/16] %v240_v35, 128  ;;  %v387_v37 = vpop.trf.xlu0 }
 0x10e   : > { %611 = vst [vmem:[%s1163_s18 + $0x1c8] sm:$0xff] %v419_v36  ;;  %595 = vst [vmem:[%s1163_s18 + $0x148] sm:$0xff] %v387_v37 }
 0x111   : > { %531 = vxpose.xlu1.b32.cont [10/16] %v249_v38, 128  ;;  %v420_v40 = vpop.trf.xlu1  ;;  %499 = vxpose.xlu0.b32.cont [10/16] %v248_v39, 128  ;;  %v388_v41 = vpop.trf.xlu0 }
 0x112   : > { %612 = vst [vmem:[%s1163_s18 + $0x1d0] sm:$0xff] %v420_v40  ;;  %596 = vst [vmem:[%s1163_s18 + $0x150] sm:$0xff] %v388_v41 }
 0x115   : > { %532 = vxpose.xlu1.b32.cont [11/16] %v257_v42, 128  ;;  %v421_v44 = vpop.trf.xlu1  ;;  %500 = vxpose.xlu0.b32.cont [11/16] %v256_v43, 128  ;;  %v389_v45 = vpop.trf.xlu0 }
 0x116   : > { %613 = vst [vmem:[%s1163_s18 + $0x1d8] sm:$0xff] %v421_v44  ;;  %597 = vst [vmem:[%s1163_s18 + $0x158] sm:$0xff] %v389_v45 }
 0x119   : > { %533 = vxpose.xlu1.b32.cont [12/16] %v265_v46, 128  ;;  %v422_v48 = vpop.trf.xlu1  ;;  %501 = vxpose.xlu0.b32.cont [12/16] %v264_v47, 128  ;;  %v390_v49 = vpop.trf.xlu0 }
 0x11a   : > { %614 = vst [vmem:[%s1163_s18 + $0x1e0] sm:$0xff] %v422_v48  ;;  %598 = vst [vmem:[%s1163_s18 + $0x160] sm:$0xff] %v390_v49 }
 0x11d   : > { %534 = vxpose.xlu1.b32.cont [13/16] %v273_v50, 128  ;;  %v423_v52 = vpop.trf.xlu1  ;;  %502 = vxpose.xlu0.b32.cont [13/16] %v272_v51, 128  ;;  %v391_v53 = vpop.trf.xlu0 }
 0x11e   : > { %615 = vst [vmem:[%s1163_s18 + $0x1e8] sm:$0xff] %v423_v52  ;;  %599 = vst [vmem:[%s1163_s18 + $0x168] sm:$0xff] %v391_v53 }
 0x121   : > { %535 = vxpose.xlu1.b32.cont [14/16] %v281_v54, 128  ;;  %v424_v56 = vpop.trf.xlu1  ;;  %503 = vxpose.xlu0.b32.cont [14/16] %v280_v55, 128  ;;  %v392_v57 = vpop.trf.xlu0 }
 0x122   : > { %616 = vst [vmem:[%s1163_s18 + $0x1f0] sm:$0xff] %v424_v56  ;;  %600 = vst [vmem:[%s1163_s18 + $0x170] sm:$0xff] %v392_v57 }
 0x125   : > { %536 = vxpose.xlu1.b32.cont [15/16] %v289_v58, 128  ;;  %v425_v60 = vpop.trf.xlu1  ;;  %504 = vxpose.xlu0.b32.cont [15/16] %v288_v59, 128  ;;  %v393_v61 = vpop.trf.xlu0 }
 0x126   : > { %617 = vst [vmem:[%s1163_s18 + $0x1f8] sm:$0xff] %v425_v60  ;;  %601 = vst [vmem:[%s1163_s18 + $0x178] sm:$0xff] %v393_v61 }
 0x129   : > { %537 = vxpose.xlu1.b32.end [16/16] %v297_v62, 128  ;;  %v474_v0 = vpop.trf.xlu1  ;;  %505 = vxpose.xlu0.b32.end [16/16] %v296_v63, 128  ;;  %v442_v1 = vpop.trf.xlu0 }
 0x12a   : > { %634 = vst [vmem:[%s1163_s18 + $0x280] sm:$0xff] %v474_v0  ;;  %618 = vst [vmem:[%s1163_s18 + $0x200] sm:$0xff] %v442_v1 }
 0x12d   : > { %v475_v2 = vpop.trf.xlu1  ;;  %v443_v3 = vpop.trf.xlu0 }
 0x12e   : > { %635 = vst [vmem:[%s1163_s18 + $0x288] sm:$0xff] %v475_v2  ;;  %619 = vst [vmem:[%s1163_s18 + $0x208] sm:$0xff] %v443_v3 }
 0x131   : > { %v476_v4 = vpop.trf.xlu1  ;;  %v444_v5 = vpop.trf.xlu0 }
 0x132   : > { %636 = vst [vmem:[%s1163_s18 + $0x290] sm:$0xff] %v476_v4  ;;  %620 = vst [vmem:[%s1163_s18 + $0x210] sm:$0xff] %v444_v5 }
 0x135   : > { %v477_v6 = vpop.trf.xlu1  ;;  %v445_v7 = vpop.trf.xlu0 }
 0x136   : > { %637 = vst [vmem:[%s1163_s18 + $0x298] sm:$0xff] %v477_v6  ;;  %621 = vst [vmem:[%s1163_s18 + $0x218] sm:$0xff] %v445_v7 }
 0x139   : > { %v478_v8 = vpop.trf.xlu1  ;;  %v446_v9 = vpop.trf.xlu0 }
 0x13a   : > { %638 = vst [vmem:[%s1163_s18 + $0x2a0] sm:$0xff] %v478_v8  ;;  %622 = vst [vmem:[%s1163_s18 + $0x220] sm:$0xff] %v446_v9 }
 0x13d   : > { %v479_v10 = vpop.trf.xlu1  ;;  %v447_v11 = vpop.trf.xlu0 }
 0x13e   : > { %639 = vst [vmem:[%s1163_s18 + $0x2a8] sm:$0xff] %v479_v10  ;;  %623 = vst [vmem:[%s1163_s18 + $0x228] sm:$0xff] %v447_v11 }
 0x141   : > { %v480_v12 = vpop.trf.xlu1  ;;  %v448_v13 = vpop.trf.xlu0 }
 0x142   : > { %640 = vst [vmem:[%s1163_s18 + $0x2b0] sm:$0xff] %v480_v12  ;;  %624 = vst [vmem:[%s1163_s18 + $0x230] sm:$0xff] %v448_v13 }
 0x145   : > { %v481_v14 = vpop.trf.xlu1  ;;  %v449_v15 = vpop.trf.xlu0 }
 0x146   : > { %641 = vst [vmem:[%s1163_s18 + $0x2b8] sm:$0xff] %v481_v14  ;;  %625 = vst [vmem:[%s1163_s18 + $0x238] sm:$0xff] %v449_v15 }
 0x149   : > { %v482_v16 = vpop.trf.xlu1  ;;  %v450_v17 = vpop.trf.xlu0 }
 0x14a   : > { %642 = vst [vmem:[%s1163_s18 + $0x2c0] sm:$0xff] %v482_v16  ;;  %626 = vst [vmem:[%s1163_s18 + $0x240] sm:$0xff] %v450_v17 }
 0x14d   : > { %v483_v18 = vpop.trf.xlu1  ;;  %v451_v19 = vpop.trf.xlu0 }
 0x14e   : > { %643 = vst [vmem:[%s1163_s18 + $0x2c8] sm:$0xff] %v483_v18  ;;  %627 = vst [vmem:[%s1163_s18 + $0x248] sm:$0xff] %v451_v19 }
 0x151   : > { %v484_v20 = vpop.trf.xlu1  ;;  %v452_v21 = vpop.trf.xlu0 }
 0x152   : > { %644 = vst [vmem:[%s1163_s18 + $0x2d0] sm:$0xff] %v484_v20  ;;  %628 = vst [vmem:[%s1163_s18 + $0x250] sm:$0xff] %v452_v21 }
 0x155   : > { %v485_v22 = vpop.trf.xlu1  ;;  %v453_v23 = vpop.trf.xlu0 }
 0x156   : > { %645 = vst [vmem:[%s1163_s18 + $0x2d8] sm:$0xff] %v485_v22  ;;  %629 = vst [vmem:[%s1163_s18 + $0x258] sm:$0xff] %v453_v23 }
 0x159   : > { %v486_v24 = vpop.trf.xlu1  ;;  %v454_v25 = vpop.trf.xlu0 }
 0x15a   : > { %646 = vst [vmem:[%s1163_s18 + $0x2e0] sm:$0xff] %v486_v24  ;;  %630 = vst [vmem:[%s1163_s18 + $0x260] sm:$0xff] %v454_v25 }
 0x15d   : > { %v487_v26 = vpop.trf.xlu1  ;;  %v455_v27 = vpop.trf.xlu0 }
 0x15e   : > { %647 = vst [vmem:[%s1163_s18 + $0x2e8] sm:$0xff] %v487_v26  ;;  %631 = vst [vmem:[%s1163_s18 + $0x268] sm:$0xff] %v455_v27 }
 0x161   : > { %v488_v28 = vpop.trf.xlu1  ;;  %v456_v29 = vpop.trf.xlu0 }
 0x162   : > { %648 = vst [vmem:[%s1163_s18 + $0x2f0] sm:$0xff] %v488_v28  ;;  %632 = vst [vmem:[%s1163_s18 + $0x270] sm:$0xff] %v456_v29 }
 0x165   : > { %v489_v30 = vpop.trf.xlu1  ;;  %v457_v31 = vpop.trf.xlu0 }
 0x166   : > { %649 = vst [vmem:[%s1163_s18 + $0x2f8] sm:$0xff] %v489_v30  ;;  %633 = vst [vmem:[%s1163_s18 + $0x278] sm:$0xff] %v457_v31 }
 0x169   : > { %v538_v32 = vpop.trf.xlu1  ;;  %v506_v33 = vpop.trf.xlu0 }
 0x16a   : > { %666 = vst [vmem:[%s1163_s18 + $0x380] sm:$0xff] %v538_v32  ;;  %650 = vst [vmem:[%s1163_s18 + $0x300] sm:$0xff] %v506_v33 }
 0x16d   : > { %v539_v34 = vpop.trf.xlu1  ;;  %v507_v35 = vpop.trf.xlu0 }
 0x16e   : > { %667 = vst [vmem:[%s1163_s18 + $0x388] sm:$0xff] %v539_v34  ;;  %651 = vst [vmem:[%s1163_s18 + $0x308] sm:$0xff] %v507_v35 }
 0x171   : > { %v540_v36 = vpop.trf.xlu1  ;;  %v508_v37 = vpop.trf.xlu0 }
 0x172   : > { %668 = vst [vmem:[%s1163_s18 + $0x390] sm:$0xff] %v540_v36  ;;  %652 = vst [vmem:[%s1163_s18 + $0x310] sm:$0xff] %v508_v37 }
 0x175   : > { %v541_v38 = vpop.trf.xlu1  ;;  %v509_v39 = vpop.trf.xlu0 }
 0x176   : > { %669 = vst [vmem:[%s1163_s18 + $0x398] sm:$0xff] %v541_v38  ;;  %653 = vst [vmem:[%s1163_s18 + $0x318] sm:$0xff] %v509_v39 }
 0x179   : > { %v542_v40 = vpop.trf.xlu1  ;;  %v510_v41 = vpop.trf.xlu0 }
 0x17a   : > { %670 = vst [vmem:[%s1163_s18 + $0x3a0] sm:$0xff] %v542_v40  ;;  %654 = vst [vmem:[%s1163_s18 + $0x320] sm:$0xff] %v510_v41 }
 0x17d   : > { %v543_v42 = vpop.trf.xlu1  ;;  %v511_v43 = vpop.trf.xlu0 }
 0x17e   : > { %671 = vst [vmem:[%s1163_s18 + $0x3a8] sm:$0xff] %v543_v42  ;;  %655 = vst [vmem:[%s1163_s18 + $0x328] sm:$0xff] %v511_v43 }
 0x181   : > { %v544_v44 = vpop.trf.xlu1  ;;  %v512_v45 = vpop.trf.xlu0 }
 0x182   : > { %672 = vst [vmem:[%s1163_s18 + $0x3b0] sm:$0xff] %v544_v44  ;;  %656 = vst [vmem:[%s1163_s18 + $0x330] sm:$0xff] %v512_v45 }
 0x185   : > { %v545_v46 = vpop.trf.xlu1  ;;  %v513_v47 = vpop.trf.xlu0 }
 0x186   : > { %673 = vst [vmem:[%s1163_s18 + $0x3b8] sm:$0xff] %v545_v46  ;;  %657 = vst [vmem:[%s1163_s18 + $0x338] sm:$0xff] %v513_v47 }
 0x189   : > { %v546_v48 = vpop.trf.xlu1  ;;  %v514_v49 = vpop.trf.xlu0 }
 0x18a   : > { %674 = vst [vmem:[%s1163_s18 + $0x3c0] sm:$0xff] %v546_v48  ;;  %658 = vst [vmem:[%s1163_s18 + $0x340] sm:$0xff] %v514_v49 }
 0x18d   : > { %v547_v50 = vpop.trf.xlu1  ;;  %v515_v51 = vpop.trf.xlu0 }
 0x18e   : > { %675 = vst [vmem:[%s1163_s18 + $0x3c8] sm:$0xff] %v547_v50  ;;  %659 = vst [vmem:[%s1163_s18 + $0x348] sm:$0xff] %v515_v51 }
 0x191   : > { %v548_v52 = vpop.trf.xlu1  ;;  %v516_v53 = vpop.trf.xlu0 }
 0x192   : > { %676 = vst [vmem:[%s1163_s18 + $0x3d0] sm:$0xff] %v548_v52  ;;  %660 = vst [vmem:[%s1163_s18 + $0x350] sm:$0xff] %v516_v53 }
 0x195   : > { %v549_v54 = vpop.trf.xlu1  ;;  %v517_v55 = vpop.trf.xlu0 }
 0x196   : > { %677 = vst [vmem:[%s1163_s18 + $0x3d8] sm:$0xff] %v549_v54  ;;  %661 = vst [vmem:[%s1163_s18 + $0x358] sm:$0xff] %v517_v55 }
 0x199   : > { %v550_v56 = vpop.trf.xlu1  ;;  %v518_v57 = vpop.trf.xlu0 }
 0x19a   : > { %678 = vst [vmem:[%s1163_s18 + $0x3e0] sm:$0xff] %v550_v56  ;;  %662 = vst [vmem:[%s1163_s18 + $0x360] sm:$0xff] %v518_v57 }
 0x19d   : > { %v551_v58 = vpop.trf.xlu1  ;;  %v519_v59 = vpop.trf.xlu0 }
 0x19e   : > { %679 = vst [vmem:[%s1163_s18 + $0x3e8] sm:$0xff] %v551_v58  ;;  %663 = vst [vmem:[%s1163_s18 + $0x368] sm:$0xff] %v519_v59 }
 0x1a1   : > { %v552_v60 = vpop.trf.xlu1  ;;  %v520_v61 = vpop.trf.xlu0 }
 0x1a2   : > { %680 = vst [vmem:[%s1163_s18 + $0x3f0] sm:$0xff] %v552_v60  ;;  %664 = vst [vmem:[%s1163_s18 + $0x370] sm:$0xff] %v520_v61 }
 0x1a5   : > { %v553_v62 = vpop.trf.xlu1  ;;  %v521_v63 = vpop.trf.xlu0 }
 0x1a6   : > { %681 = vst [vmem:[%s1163_s18 + $0x3f8] sm:$0xff] %v553_v62  ;;  %665 = vst [vmem:[%s1163_s18 + $0x378] sm:$0xff] %v521_v63 }
 0x1a7   : > { %916 = shalt.err (!%p913_p6)
}
 0x1a8   : > { %s917_s4 = scalar_lea.hbm %s1360_s28, 16384  ;;  %s921_s13 = scalar_lea.hbm %s1413_s1, 32768 }
 0x1a9   : > { %p918_p7 = scmp.ne.s32.totalorder %s1360_s28, %s917_s4  ;;  %p922_p13 = scmp.lt.s32.totalorder %s1360_s28, %s1413_s1 }
 0x1aa   : > { %p923_p2 = scmp.lt.s32.totalorder %s921_s13, %s917_s4 }
 0x1ab   : > { %p919_p10 = pnand %p918_p7, %p1052_p9 }
 0x1ac   : > { %p924_p8 = por %p923_p2, %p922_p13 }
 0x1ad   : > { %p920_p4 = pneg %p919_p10 }
 0x1af   : > { %p925_p12 = pnand %p924_p8, %p920_p4 }
 0x1b1   : > { %928 = shalt.err (!%p925_p12)
}
 0x1b2   : > { %s989_s22 = smov 128   ;;  %s990_s23 = smov 8  }
 0x1b3   : > { %811 = dma.vmem_to_hbm [thread:$0]  (%p1052_p9), %s1362_s25, 16384, %s1360_s28, %s683_s9, %s989_s22, %s989_s22, %s990_s23  }
 0x1b4 PF: > { %s714_s18 = sand.u32 1, %s963_s6   ;;  %p1419_p0 = scmp.ge.s32.totalorder %s983_s11, 2 }
 0x1b5   : > { %s715_s24 = scalar_lea.sflag [#allocation4], %s714_s18 }
 0x1b6   : > { %p818_p1 = pnand %p1419_p0, %p1059_p11 }
 0x1b8   : > { %p819_p3 = pneg %p818_p1 }
 0x1ba   : > { %958 = dma.done.wait (%p819_p3), %s715_s24, 16384  }
 0x1bb   : > { %960 = vsyncadd (%p819_p3), %s715_s24, 4294950912  ;;  %s17_s11 = sadd.s32 1, %s983_s11   ;;  %s1420_s6 = smov %s967_s7 }
 0x1bc   : > { %p14_p5 = scmp.ge.s32.totalorder %s17_s11, 4   ;;  %s1421_s7 = smov %s971_s8 }
 0x1bd   : > { %s1422_s8 = smov %s1057_s20  ;;  %s1423_s9 = smov %s979_s10 }
 0x1be   : > { %s1424_s10 = smov %s1426_s14  ;;  %16 = sbr.rel (!%p14_p5) target bundleno = 6 (0x6), region = 69 }
 0x1c3   :  { %720 = vsyncpa [#allocation3], 1 }
 0x1c4   :  { %722 = vsyncpa [#allocation3 + $0x1], 1 }
 0x1c5   :  { %723 = vsyncpa [#allocation4], 1 }
 0x1c6   :  { %725 = vsyncpa [#allocation4 + $0x1], 1 }

</bundles_post_ra>
